<compile_context>
chip_gen: v7x
topology: tpu7x:2x2x1
jax: 0.10.0
libtpu: 0.0.40
codegen_flags: <defaults>
</compile_context>

<pallas_src>
import functools

import jax
import jax.numpy as jnp
from jax.experimental import pallas as pl
from jax.experimental.pallas import tpu as pltpu

ALPHA = 0.05
_LANES = 128
_SUBLANES = 8
_MAX_TILE_ROWS = 2048   # rows of 128 lanes per grid step (1 MiB f32 / input)


def _bce_blur_kernel(pred_ref, true_ref, out_ref, *, inv_alpha, n_valid,
                     block_elems, needs_mask):
    x = pred_ref[...].astype(jnp.float32)   # (G, 8, 128)
    t = true_ref[...].astype(jnp.float32)

    # BCEWithLogitsLoss (reduction='none'), numerically stable form:
    #   bce = max(x, 0) - x*t + log(1 + exp(-|x|))
    e = jnp.exp(-jnp.abs(x))                # single exp, reused for sigmoid
    bce = jnp.maximum(x, 0.0) - x * t + jnp.log1p(e)

    # sigmoid(x) = where(x >= 0, 1, e) / (1 + e), reusing e = exp(-|x|)
    p = jnp.where(x >= 0.0, 1.0, e) * pl.reciprocal(1.0 + e)
    dx = p - t
    alpha_factor = 1.0 - jnp.exp((dx - 1.0) * inv_alpha)
    loss = bce * alpha_factor

    if needs_mask:  # static Python bool: only traced when input was padded
        i = pl.program_id(0)
        g = jax.lax.broadcasted_iota(jnp.int32, loss.shape, 0)
        r = jax.lax.broadcasted_iota(jnp.int32, loss.shape, 1)
        c = jax.lax.broadcasted_iota(jnp.int32, loss.shape, 2)
        flat = i * block_elems + (g * _SUBLANES + r) * _LANES + c
        loss = jnp.where(flat < n_valid, loss, 0.0)

    # Per-block partial sums collapsed onto one (8,128) vreg; the only
    # cross-lane work (final scalar reduce) happens outside the kernel.
    out_ref[...] = jnp.sum(loss, axis=0, keepdims=True)


def bce_blur_with_logits_loss(pred, true, alpha=ALPHA):
    assert pred.shape == true.shape
    n = pred.size
    rows = pl.cdiv(n, _LANES)
    if rows <= _MAX_TILE_ROWS:
        tile_rows = ((rows + _SUBLANES - 1) // _SUBLANES) * _SUBLANES
    else:
        tile_rows = _MAX_TILE_ROWS
    padded_rows = pl.cdiv(rows, tile_rows) * tile_rows
    padded = padded_rows * _LANES
    needs_mask = padded != n

    pred_flat = jnp.ravel(pred)
    true_flat = jnp.ravel(true)
    if needs_mask:
        pad = padded - n
        pred_flat = jnp.pad(pred_flat, (0, pad))
        true_flat = jnp.pad(true_flat, (0, pad))

    groups = padded_rows // _SUBLANES
    g_per_tile = tile_rows // _SUBLANES
    pred3d = pred_flat.reshape(groups, _SUBLANES, _LANES)
    true3d = true_flat.reshape(groups, _SUBLANES, _LANES)
    num_blocks = padded_rows // tile_rows

    kernel = functools.partial(
        _bce_blur_kernel,
        inv_alpha=1.0 / (alpha + 0.0001),
        n_valid=n,
        block_elems=tile_rows * _LANES,
        needs_mask=needs_mask)

    partials = pl.pallas_call(
        kernel,
        out_shape=jax.ShapeDtypeStruct((num_blocks, _SUBLANES, _LANES),
                                       jnp.float32),
        grid_spec=pltpu.PrefetchScalarGridSpec(
            num_scalar_prefetch=0,
            grid=(num_blocks,),
            in_specs=[
                pl.BlockSpec((g_per_tile, _SUBLANES, _LANES),
                             lambda i: (i, 0, 0)),
                pl.BlockSpec((g_per_tile, _SUBLANES, _LANES),
                             lambda i: (i, 0, 0)),
            ],
            out_specs=pl.BlockSpec((1, _SUBLANES, _LANES),
                                   lambda i: (i, 0, 0)),
        ),
        compiler_params=pltpu.CompilerParams(
            dimension_semantics=("parallel",)),
    )(pred3d, true3d)

    return jnp.sum(partials) / jnp.float32(n)


def _reference(pred, true, alpha=ALPHA):
    x = pred.astype(jnp.float32)
    t = true.astype(jnp.float32)
    bce = jnp.maximum(x, 0.0) - x * t + jnp.log1p(jnp.exp(-jnp.abs(x)))
    p = jax.nn.sigmoid(x)
    dx = p - t
    af = 1.0 - jnp.exp((dx - 1.0) / (alpha + 0.0001))
    return jnp.mean(bce * af)


if __name__ == "__main__":
    key = jax.random.PRNGKey(0)
    k1, k2 = jax.random.split(key)
    # NCHW inputs, as the PyTorch module would receive from a conv head.
    pred = jax.random.normal(k1, (2, 4, 16, 16), dtype=jnp.float32)
    true = (jax.random.uniform(k2, (2, 4, 16, 16)) > 0.5).astype(jnp.float32)

    loss = bce_blur_with_logits_loss(pred, true)
    jax.block_until_ready(loss)

    ref = _reference(pred, true)
    assert jnp.allclose(loss, ref, rtol=1e-5, atol=1e-5), (loss, ref)
    print("KERNEL_OK")
</pallas_src>

<mosaic_0001>
module attributes {stable_mosaic.version = 11 : i64} {
  func.func @_bce_blur_kernel(%arg0: i32, %arg1: memref<2x8x128xf32, #tpu.memory_space<vmem>>, %arg2: memref<2x8x128xf32, #tpu.memory_space<vmem>>, %arg3: memref<1x8x128xf32, #tpu.memory_space<vmem>>) attributes {dimension_semantics = [#tpu.dimension_semantics<parallel>], iteration_bounds = array<i64: 1>, scalar_prefetch = 0 : i64, scratch_operands = 0 : i64, tpu.core_type = #tpu.core_type<tc>, window_params = [{transform_indices = @transform_0, window_bounds = array<i64: 2, 8, 128>}, {transform_indices = @transform_1, window_bounds = array<i64: 2, 8, 128>}, {transform_indices = @transform_2, window_bounds = array<i64: 1, 8, 128>}]} {
    %c0 = arith.constant 0 : index
    %c0_0 = arith.constant 0 : index
    %c0_1 = arith.constant 0 : index
    %0 = vector.load %arg1[%c0, %c0_0, %c0_1] : memref<2x8x128xf32, #tpu.memory_space<vmem>>, vector<2x8x128xf32>
    %c0_2 = arith.constant 0 : index
    %c0_3 = arith.constant 0 : index
    %c0_4 = arith.constant 0 : index
    %1 = vector.load %arg2[%c0_2, %c0_3, %c0_4] : memref<2x8x128xf32, #tpu.memory_space<vmem>>, vector<2x8x128xf32>
    %2 = math.absf %0 : vector<2x8x128xf32>
    %cst = arith.constant 0.000000e+00 : f32
    %3 = vector.broadcast %cst : f32 to vector<2x8x128xf32>
    %4 = arith.subf %3, %2 : vector<2x8x128xf32>
    %5 = math.exp %4 : vector<2x8x128xf32>
    %cst_5 = arith.constant 0.000000e+00 : f32
    %6 = vector.broadcast %cst_5 : f32 to vector<2x8x128xf32>
    %7 = arith.maximumf %0, %6 : vector<2x8x128xf32>
    %8 = arith.mulf %0, %1 : vector<2x8x128xf32>
    %9 = arith.subf %7, %8 : vector<2x8x128xf32>
    %10 = math.log1p %5 : vector<2x8x128xf32>
    %11 = arith.addf %9, %10 : vector<2x8x128xf32>
    %cst_6 = arith.constant 0.000000e+00 : f32
    %12 = vector.broadcast %cst_6 : f32 to vector<2x8x128xf32>
    %13 = arith.cmpf oge, %0, %12 : vector<2x8x128xf32>
    %cst_7 = arith.constant 1.000000e+00 : f32
    %14 = vector.broadcast %cst_7 : f32 to vector<2x8x128xf32>
    %15 = arith.select %13, %14, %5 : vector<2x8x128xi1>, vector<2x8x128xf32>
    %cst_8 = arith.constant 1.000000e+00 : f32
    %16 = vector.broadcast %cst_8 : f32 to vector<2x8x128xf32>
    %17 = arith.addf %16, %5 : vector<2x8x128xf32>
    %18 = tpu.reciprocal %17 : vector<2x8x128xf32> -> vector<2x8x128xf32>
    %19 = arith.mulf %15, %18 : vector<2x8x128xf32>
    %20 = arith.subf %19, %1 : vector<2x8x128xf32>
    %cst_9 = arith.constant 1.000000e+00 : f32
    %21 = vector.broadcast %cst_9 : f32 to vector<2x8x128xf32>
    %22 = arith.subf %20, %21 : vector<2x8x128xf32>
    %cst_10 = arith.constant 19.9600792 : f32
    %23 = vector.broadcast %cst_10 : f32 to vector<2x8x128xf32>
    %24 = arith.mulf %22, %23 : vector<2x8x128xf32>
    %25 = math.exp %24 : vector<2x8x128xf32>
    %cst_11 = arith.constant 1.000000e+00 : f32
    %26 = vector.broadcast %cst_11 : f32 to vector<2x8x128xf32>
    %27 = arith.subf %26, %25 : vector<2x8x128xf32>
    %28 = arith.mulf %11, %27 : vector<2x8x128xf32>
    %cst_12 = arith.constant dense<0.000000e+00> : vector<8x128xf32>
    %29 = vector.multi_reduction <add>, %28, %cst_12 [0] : vector<2x8x128xf32> to vector<8x128xf32>
    %30 = vector.shape_cast %29 : vector<8x128xf32> to vector<1x8x128xf32>
    %c0_13 = arith.constant 0 : index
    %c0_14 = arith.constant 0 : index
    %c0_15 = arith.constant 0 : index
    %31 = vector.load %arg3[%c0_13, %c0_14, %c0_15] : memref<1x8x128xf32, #tpu.memory_space<vmem>>, vector<1x8x128xf32>
    tpu.vector_store %arg3[%c0_13, %c0_14, %c0_15], %30 {strides = array<i32>} : memref<1x8x128xf32, #tpu.memory_space<vmem>>, vector<1x8x128xf32>,
    return
  }
  func.func @transform_0(%arg0: i32) -> (i32, i32, i32) {
    %c0_i32 = arith.constant 0 : i32
    %c0_i32_0 = arith.constant 0 : i32
    %c0_i32_1 = arith.constant 0 : i32
    return %arg0, %c0_i32, %c0_i32_0 : i32, i32, i32
  }
  func.func @transform_1(%arg0: i32) -> (i32, i32, i32) {
    %c0_i32 = arith.constant 0 : i32
    %c0_i32_0 = arith.constant 0 : i32
    %c0_i32_1 = arith.constant 0 : i32
    return %arg0, %c0_i32, %c0_i32_0 : i32, i32, i32
  }
  func.func @transform_2(%arg0: i32) -> (i32, i32, i32) {
    %c0_i32 = arith.constant 0 : i32
    %c0_i32_0 = arith.constant 0 : i32
    %c0_i32_1 = arith.constant 0 : i32
    return %arg0, %c0_i32, %c0_i32_0 : i32, i32, i32
  }
}

</mosaic_0001>

<bundles_post_ra>
// kernel: tpu_custom_call.1
= control target key start
LH: loop header
LB: loop body
LE: loop exit
PB: predicated region body
PF: predicated region fallthrough
CT: control target
= control target key end

     0   :  { %7 = vsyncpa [#allocation3], 0  ;;  %s271_s0 = inlined_call_operand.hbm [shape: f32[2,8,128], index: 0, kind: input, shape index: {}]   ;;  %s272_s1 = inlined_call_operand.hbm [shape: f32[2,8,128], index: 1, kind: input, shape index: {}]   ;;  %s273_s2 = inlined_call_operand.hbm [shape: f32[1,8,128], index: 2, kind: output, shape index: {}]  }
   0x1   :  { %8 = vsyncpa [#allocation6], 0 }
   0x2   :  { %9 = vsyncpa [#allocation4], 0  ;;  %s215_s9 = smov [#allocation2]   ;;  %s143_s13 = scalar_lea.hbm %s271_s0, 256 }
   0x3   :  { %s15_s10 = sshll.u32 %s215_s9, 4  ;;  %p144_p0 = scmp.ne.s32.totalorder %s271_s0, %s143_s13  ;;  %s16_s10 = int_to_ptr.vmem [resolvable:$true] %s15_s10 }
   0x4   :  { %p147_p1 = scmp.lt.u32.totalorder %s143_s13, %s271_s0 }
   0x6   :  { %p149_p2 = pnand %p147_p1, %p144_p0 }
   0x8   :  { %152 = shalt.err (!%p149_p2)
}
   0x9   :  { %s153_s18 = scalar_lea.vmem %s16_s10, 256  ;;  %p158_p4 = scmp.lt.s32.totalorder %s16_s10, %s16_s10 }
   0xa   :  { %p154_p3 = scmp.ne.s32.totalorder %s16_s10, %s153_s18  ;;  %p159_p5 = scmp.lt.s32.totalorder %s153_s18, %s153_s18 }
   0xc   :  { %p160_p6 = por %p159_p5, %p158_p4 }
   0xe   :  { %p161_p7 = pnand %p160_p6, %p154_p3 }
  0x10   :  { %164 = shalt.err (!%p161_p7)
}
  0x11   :  { %s216_s19 = smov 128   ;;  %s217_s20 = smov 8  }
  0x12   :  { %21 = dma.hbm_to_vmem [thread:$0]  %s271_s0, 256, %s16_s10, [#allocation3], %s216_s19, %s216_s19, %s217_s20  }
  0x13   :  { %s218_s23 = smov [#allocation5]   ;;  %s165_s27 = scalar_lea.hbm %s272_s1, 256 }
  0x14   :  { %s27_s24 = sshll.u32 %s218_s23, 4  ;;  %p166_p8 = scmp.ne.s32.totalorder %s272_s1, %s165_s27  ;;  %s28_s24 = int_to_ptr.vmem [resolvable:$true] %s27_s24 }
  0x15   :  { %p169_p9 = scmp.lt.u32.totalorder %s165_s27, %s272_s1 }
  0x17   :  { %p171_p10 = pnand %p169_p9, %p166_p8 }
  0x19   :  { %174 = shalt.err (!%p171_p10)
}
  0x1a   :  { %s175_s4 = scalar_lea.vmem %s28_s24, 256  ;;  %p180_p12 = scmp.lt.s32.totalorder %s28_s24, %s28_s24 }
  0x1b   :  { %p176_p11 = scmp.ne.s32.totalorder %s28_s24, %s175_s4  ;;  %p181_p13 = scmp.lt.s32.totalorder %s175_s4, %s175_s4 }
  0x1d   :  { %p182_p0 = por %p181_p13, %p180_p12 }
  0x1f   :  { %p183_p1 = pnand %p182_p0, %p176_p11 }
  0x21   :  { %186 = shalt.err (!%p183_p1)
}
  0x22   :  { %33 = dma.hbm_to_vmem [thread:$0]  %s272_s1, 256, %s28_s24, [#allocation6], %s216_s19, %s216_s19, %s217_s20  }
  0x23   :  { %209 = dma.done.wait [#allocation3], 256  }
  0x24   :  { %210 = vsyncadd [#allocation3], 4294967040 }
  0x25   :  { %211 = dma.done.wait [#allocation6], 256  }
  0x26   :  { %212 = vsyncadd [#allocation6], 4294967040  ;;  %v40_v0 = vld [vmem:[#allocation2] sm:$0xff]  ;;  %v41_v1 = vld [vmem:[#allocation2 + $0x8] sm:$0xff]  ;;  %s219_s1 = smov [#allocation7]  }
  0x27   :  { %v44_v2 = vand.u32 2147483647, %v40_v0  ;;  %v45_v3 = vand.u32 2147483647, %v41_v1  ;;  %vm78_vm0 = vcmp.ge.f32.partialorder %v40_v0, 0.0  ;;  %vm79_vm1 = vcmp.ge.f32.partialorder %v41_v1, 0.0 }
  0x28   :  { %v42_v15 = vld [vmem:[#allocation5] sm:$0xff]  ;;  %v43_v17 = vld [vmem:[#allocation5 + $0x8] sm:$0xff]  ;;  %v52_v36 = vmax.f32 %v40_v0, 0.0  ;;  %v53_v38 = vmax.f32 %v41_v1, 0.0  ;;  %s110_s6 = sshll.u32 %s219_s1, 4  ;;  %s111_s6 = int_to_ptr.vmem [resolvable:$true] %s110_s6 }
  0x29   :  { %v46_v4 = vsub.f32 0.0, %v44_v2  ;;  %v47_v5 = vsub.f32 0.0, %v45_v3  ;;  %v54_v37 = vmul.f32 %v42_v15, %v40_v0  ;;  %v55_v39 = vmul.f32 %v43_v17, %v41_v1  ;;  %s187_s7 = scalar_lea.vmem %s111_s6, 128  ;;  %p192_p3 = scmp.lt.s32.totalorder %s111_s6, %s111_s6 }
  0x2a   :  { %p188_p2 = scmp.ne.s32.totalorder %s111_s6, %s187_s7  ;;  %p193_p4 = scmp.lt.s32.totalorder %s187_s7, %s187_s7 }
  0x2b   :  { %v48_v6 = vmul.f32 1.442695, %v46_v4  ;;  %v50_v7 = vmul.f32 1.442695, %v47_v5  ;;  %v56_v44 = vsub.f32 %v52_v36, %v54_v37  ;;  %v57_v45 = vsub.f32 %v53_v38, %v55_v39 }
  0x2c   :  { %p194_p5 = por %p193_p4, %p192_p3 }
  0x2d   :  { %127 = vpow2.f32 %v48_v6 }
  0x2e   :  { %129 = vpow2.f32 %v50_v7  ;;  %p195_p6 = pnand %p194_p5, %p188_p2 }
  0x37   :  { %v128_v8 = vpop.eup %127 }
  0x38   :  { %v130_v9 = vpop.eup %129  ;;  %v58_v10 = vadd.f32 1.0, %v128_v8  ;;  %v80_v12 = vsel %vm78_vm0, 1.0, %v128_v8  ;;  %v61_v22 = vmul.f32 -0.5, %v128_v8  ;;  %v64_v31 = vand.u32 2147483647, %v128_v8 }
  0x39   :  { %v67_v11 = vadd.f32 1.0, %v130_v9  ;;  %v81_v13 = vsel %vm79_vm1, 1.0, %v130_v9  ;;  %v70_v24 = vmul.f32 -0.5, %v130_v9  ;;  %v73_v35 = vand.u32 2147483647, %v130_v9 }
  0x3a   :  { %131 = vrcp.f32 %v58_v10  ;;  %v62_v28 = vadd.f32 1.0, %v61_v22  ;;  %vm65_vm2 = vcmp.lt.f32.partialorder %v64_v31, 0.0004427343 }
  0x3b   :  { %133 = vrcp.f32 %v67_v11  ;;  %v71_v32 = vadd.f32 1.0, %v70_v24  ;;  %vm74_vm3 = vcmp.lt.f32.partialorder %v73_v35, 0.0004427343 }
  0x3c   :  { %135 = vlog2.f32 %v58_v10  ;;  %v63_v41 = vmul.f32 %v128_v8, %v62_v28 }
  0x3d   :  { %137 = vlog2.f32 %v67_v11  ;;  %v72_v43 = vmul.f32 %v130_v9, %v71_v32 }
  0x44   :  { %v132_v14 = vpop.eup %131 }
  0x45   :  { %v134_v16 = vpop.eup %133  ;;  %v86_v18 = vmul.f32 %v132_v14, %v80_v12 }
  0x46   :  { %v87_v19 = vmul.f32 %v134_v16, %v81_v13  ;;  %v136_v30 = vpop.eup %135 }
  0x47   :  { %v88_v20 = vsub.f32 %v86_v18, %v42_v15  ;;  %v138_v34 = vpop.eup %137  ;;  %v60_v40 = vmul.f32 0.6931472, %v136_v30 }
  0x48   :  { %v89_v21 = vsub.f32 %v87_v19, %v43_v17  ;;  %v69_v42 = vmul.f32 0.6931472, %v138_v34 }
  0x49   :  { %v120_v23 = vadd.f32 -1.0, %v88_v20  ;;  %v66_v46 = vsel %vm65_vm2, %v63_v41, %v60_v40 }
  0x4a   :  { %v121_v25 = vadd.f32 -1.0, %v89_v21  ;;  %v75_v47 = vsel %vm74_vm3, %v72_v43, %v69_v42  ;;  %v76_v48 = vadd.f32 %v66_v46, %v56_v44 }
  0x4b   :  { %v92_v26 = vmul.f32 19.96008, %v120_v23  ;;  %v77_v50 = vadd.f32 %v75_v47, %v57_v45 }
  0x4c   :  { %v93_v27 = vmul.f32 19.96008, %v121_v25 }
  0x4d   :  { %v94_v29 = vmul.f32 1.442695, %v92_v26 }
  0x4e   :  { %v96_v33 = vmul.f32 1.442695, %v93_v27 }
  0x4f   :  { %139 = vpow2.f32 %v94_v29 }
  0x50   :  { %141 = vpow2.f32 %v96_v33 }
  0x59   :  { %v140_v49 = vpop.eup %139 }
  0x5a   :  { %v142_v51 = vpop.eup %141  ;;  %v98_v52 = vsub.f32 1.0, %v140_v49 }
  0x5b   :  { %v99_v53 = vsub.f32 1.0, %v142_v51 }
  0x5c   :  { %v100_v54 = vmul.f32 %v98_v52, %v76_v48 }
  0x5d   :  { %v101_v55 = vmul.f32 %v99_v53, %v77_v50 }
  0x5f   :  { %v102_v56 = vadd.f32 %v101_v55, %v100_v54 }
  0x61   :  { %103 = vst [vmem:[#allocation7] sm:$0xff] %v102_v56 }
  0x62   :  { %198 = shalt.err (!%p195_p6)
}
  0x63   :  { %s199_s10 = scalar_lea.hbm %s273_s2, 128 }
  0x64   :  { %p200_p7 = scmp.ne.s32.totalorder %s273_s2, %s199_s10  ;;  %p203_p8 = scmp.lt.u32.totalorder %s199_s10, %s273_s2 }
  0x66   :  { %p205_p9 = pnand %p203_p8, %p200_p7 }
  0x68   :  { %208 = shalt.err (!%p205_p9)
}
  0x69   :  { %113 = dma.vmem_to_hbm [thread:$0]  %s111_s6, 128, %s273_s2, [#allocation4]  }
  0x6a   :  { %213 = dma.done.wait [#allocation4], 128  }
  0x6b   :  { %214 = vsyncadd [#allocation4], 4294967168 }
  0x6c   :  { %117 = vsyncpa [#allocation3], 1 }
  0x6d   :  { %118 = vsyncpa [#allocation6], 1 }
  0x6e   :  { %119 = vsyncpa [#allocation4], 1 }

</bundles_post_ra>
